<compile_context>
chip_gen: v6e
topology: v6e:2x2x1
jax: 0.10.0
libtpu: 0.0.40
codegen_flags: <defaults>
</compile_context>

<pallas_src>
import jax
import jax.numpy as jnp
from jax.experimental import pallas as pl
from jax.experimental.pallas import tpu as pltpu

HIDDEN = 768          # fixed by the module (nn.Linear(768, class_num))
CLASS_NUM = 16        # small class count for the synthetic run
BATCH = 2


def _head_kernel(x_ref, w_ref, b_ref, lbl_ref, cls_ref, onehot_ref):
    """x: [Bp, H] bf16 (VMEM), w: [Cp, H] bf16 (VMEM), b: [1, Cp] f32 (VMEM),
    lbl: [Bp] int32 (SMEM).  Outputs: cls [Bp, Cp] f32, onehot [Bp, Cp] f32."""
    x = x_ref[...]
    w = w_ref[...]

    # Linear layer: x @ w.T with f32 accumulation on the MXU ("trans_b" so the
    # weight stays in its lane-dense native [C, H] layout).
    acc = jax.lax.dot_general(
        x, w,
        dimension_numbers=(((1,), (1,)), ((), ())),
        preferred_element_type=jnp.float32,
    )                                                  # [Bp, Cp] f32
    cls_ref[...] = acc + b_ref[...]                    # bias broadcast [1,Cp]

    # One-hot (torch.zeros(...).scatter_(1, labels, 1)) from SMEM scalars.
    bp, cp = onehot_ref.shape
    col = jax.lax.broadcasted_iota(jnp.int32, (bp, cp), 1)
    row = jax.lax.broadcasted_iota(jnp.int32, (bp, cp), 0)
    oh = jnp.zeros((bp, cp), jnp.float32)
    for i in range(bp):                                # static, tiny unroll
        oh = jnp.where((row == i) & (col == lbl_ref[i]), 1.0, oh)
    onehot_ref[...] = oh


def classifier_head(x, w_ch, b, labels, class_num):
    """x: [B, H] f32, w_ch: [C, H] f32 (native nn.Linear layout),
    b: [C] f32, labels: [B] int.  Returns (cls_out [B, C] f32, one_hot [B, C] f32)."""
    bsz, hidden = x.shape

    # Pad to full (8, 128) tiles so every load/store is lane/sublane dense.
    b_pad = max(8, ((bsz + 7) // 8) * 8)
    c_pad = max(128, ((class_num + 127) // 128) * 128)

    x_p = jnp.zeros((b_pad, hidden), jnp.bfloat16).at[:bsz].set(
        x.astype(jnp.bfloat16))
    w_p = jnp.zeros((c_pad, hidden), jnp.bfloat16).at[:class_num].set(
        w_ch.astype(jnp.bfloat16))
    b_p = jnp.zeros((1, c_pad), jnp.float32).at[0, :class_num].set(
        b.astype(jnp.float32))
    lbl_p = jnp.zeros((b_pad,), jnp.int32).at[:bsz].set(labels.astype(jnp.int32))

    cls_out, one_hot = pl.pallas_call(
        _head_kernel,
        out_shape=(
            jax.ShapeDtypeStruct((b_pad, c_pad), jnp.float32),
            jax.ShapeDtypeStruct((b_pad, c_pad), jnp.float32),
        ),
        in_specs=[
            pl.BlockSpec(memory_space=pltpu.VMEM),   # x  (bf16, lane-dense)
            pl.BlockSpec(memory_space=pltpu.VMEM),   # w  (bf16, native [C,H])
            pl.BlockSpec(memory_space=pltpu.VMEM),   # bias (padded to 128)
            pl.BlockSpec(memory_space=pltpu.SMEM),   # labels (scalar memory)
        ],
        out_specs=(
            pl.BlockSpec(memory_space=pltpu.VMEM),
            pl.BlockSpec(memory_space=pltpu.VMEM),
        ),
    )(x_p, w_p, b_p, lbl_p)

    return cls_out[:bsz, :class_num], one_hot[:bsz, :class_num]


def mymodel_forward(x_tuple, w_ch, b, class_num):
    """Mirrors MyModel.forward. x_tuple = (b_labels, inputs, s, p, o)."""
    b_labels, inputs, s, p, o = x_tuple
    # torch.stack(list(inputs)).squeeze(1): inputs is [B, 1, 768] -> [B, 768]
    feats = jnp.squeeze(inputs, axis=1)
    cls_output, one_hot_label = classifier_head(feats, w_ch, b, b_labels, class_num)
    labels = b_labels
    return (cls_output, labels, one_hot_label, s, p, o)


if __name__ == "__main__":
    key = jax.random.PRNGKey(0)
    k_in, k_w, k_b, k_lbl = jax.random.split(key, 4)

    # Deterministic "checkpoint": classifier weight in native nn.Linear layout
    # [C, H] (no transpose — the kernel contracts over the last dim of both).
    w_ch = jax.random.normal(k_w, (CLASS_NUM, HIDDEN), jnp.float32) * 0.02
    b = jax.random.normal(k_b, (CLASS_NUM,), jnp.float32) * 0.02

    # Example inputs: precomputed ViLT pooled features, stacked -> [B, 1, 768]
    inputs = jax.random.normal(k_in, (BATCH, 1, HIDDEN), jnp.float32)
    b_labels = jax.random.randint(k_lbl, (BATCH,), 0, CLASS_NUM, jnp.int32)
    s = jnp.arange(BATCH, dtype=jnp.int32)        # passthrough metadata
    p = jnp.arange(BATCH, dtype=jnp.int32)
    o = jnp.arange(BATCH, dtype=jnp.int32)

    out = mymodel_forward((b_labels, inputs, s, p, o), w_ch, b, CLASS_NUM)
    out = jax.block_until_ready(out)

    cls_output, labels, one_hot_label, s_o, p_o, o_o = out

    # Sanity checks against pure-JAX references.
    feats = jnp.squeeze(inputs, 1)
    ref_cls_f32 = feats @ w_ch.T + b
    ref_cls_bf16 = (
        jnp.dot(feats.astype(jnp.bfloat16), w_ch.astype(jnp.bfloat16).T,
                preferred_element_type=jnp.float32) + b
    )
    ref_oh = jax.nn.one_hot(b_labels, CLASS_NUM, dtype=jnp.float32)

    assert cls_output.shape == (BATCH, CLASS_NUM)
    assert one_hot_label.shape == (BATCH, CLASS_NUM)
    # bf16 operands -> compare tightly against the bf16 reference and loosely
    # against the f32 reference.
    assert jnp.allclose(cls_output, ref_cls_bf16, atol=1e-2, rtol=1e-2)
    assert jnp.allclose(cls_output, ref_cls_f32, atol=5e-2, rtol=5e-2)
    assert jnp.allclose(one_hot_label, ref_oh)
    assert jnp.array_equal(labels, b_labels)

    print("KERNEL_OK")
</pallas_src>

<mosaic_0001>
module attributes {stable_mosaic.version = 11 : i64} {
  func.func @_head_kernel(%arg0: memref<8x768xbf16, #tpu.memory_space<vmem>>, %arg1: memref<128x768xbf16, #tpu.memory_space<vmem>>, %arg2: memref<1x128xf32, #tpu.memory_space<vmem>>, %arg3: memref<8xi32, #tpu.memory_space<smem>>, %arg4: memref<8x128xf32, #tpu.memory_space<vmem>>, %arg5: memref<8x128xf32, #tpu.memory_space<vmem>>) attributes {dimension_semantics = [], scalar_prefetch = 0 : i64, scratch_operands = 0 : i64, tpu.core_type = #tpu.core_type<tc>} {
    %c0 = arith.constant 0 : index
    %c0_0 = arith.constant 0 : index
    %0 = vector.load %arg0[%c0, %c0_0] : memref<8x768xbf16, #tpu.memory_space<vmem>>, vector<8x768xbf16>
    %c0_1 = arith.constant 0 : index
    %c0_2 = arith.constant 0 : index
    %1 = vector.load %arg1[%c0_1, %c0_2] : memref<128x768xbf16, #tpu.memory_space<vmem>>, vector<128x768xbf16>
    %cst = arith.constant dense<0.000000e+00> : vector<8x128xf32>
    %2 = tpu.matmul %0, %1, %cst {dimension_numbers = #tpu.dot_dimension_numbers<[1], [1], [0], [0], [0, 0, 1, 0], [], []>} : vector<8x768xbf16>, vector<128x768xbf16>, vector<8x128xf32> -> vector<8x128xf32>
    %c0_3 = arith.constant 0 : index
    %c0_4 = arith.constant 0 : index
    %3 = vector.load %arg2[%c0_3, %c0_4] : memref<1x128xf32, #tpu.memory_space<vmem>>, vector<1x128xf32>
    %4 = vector.broadcast %3 : vector<1x128xf32> to vector<8x128xf32>
    %5 = arith.addf %2, %4 : vector<8x128xf32>
    %c0_5 = arith.constant 0 : index
    %c0_6 = arith.constant 0 : index
    %6 = vector.load %arg4[%c0_5, %c0_6] : memref<8x128xf32, #tpu.memory_space<vmem>>, vector<8x128xf32>
    tpu.vector_store %arg4[%c0_5, %c0_6], %5 {strides = array<i32>} : memref<8x128xf32, #tpu.memory_space<vmem>>, vector<8x128xf32>,
    %7 = tpu.iota {dimensions = array<i32: 1>} : vector<8x128xi32>
    %8 = tpu.iota {dimensions = array<i32: 0>} : vector<8x128xi32>
    %cst_7 = arith.constant 0.000000e+00 : f32
    %9 = vector.broadcast %cst_7 : f32 to vector<8x128xf32>
    %c0_i32 = arith.constant 0 : i32
    %10 = vector.broadcast %c0_i32 : i32 to vector<8x128xi32>
    %11 = arith.cmpi eq, %8, %10 : vector<8x128xi32>
    %c0_8 = arith.constant 0 : index
    %12 = memref.load %arg3[%c0_8] : memref<8xi32, #tpu.memory_space<smem>>
    %13 = vector.broadcast %12 : i32 to vector<8x128xi32>
    %14 = arith.cmpi eq, %7, %13 : vector<8x128xi32>
    %15 = arith.andi %11, %14 : vector<8x128xi1>
    %cst_9 = arith.constant 1.000000e+00 : f32
    %16 = vector.broadcast %cst_9 : f32 to vector<8x128xf32>
    %17 = arith.select %15, %16, %9 : vector<8x128xi1>, vector<8x128xf32>
    %c1_i32 = arith.constant 1 : i32
    %18 = vector.broadcast %c1_i32 : i32 to vector<8x128xi32>
    %19 = arith.cmpi eq, %8, %18 : vector<8x128xi32>
    %c1 = arith.constant 1 : index
    %20 = memref.load %arg3[%c1] : memref<8xi32, #tpu.memory_space<smem>>
    %21 = vector.broadcast %20 : i32 to vector<8x128xi32>
    %22 = arith.cmpi eq, %7, %21 : vector<8x128xi32>
    %23 = arith.andi %19, %22 : vector<8x128xi1>
    %cst_10 = arith.constant 1.000000e+00 : f32
    %24 = vector.broadcast %cst_10 : f32 to vector<8x128xf32>
    %25 = arith.select %23, %24, %17 : vector<8x128xi1>, vector<8x128xf32>
    %c2_i32 = arith.constant 2 : i32
    %26 = vector.broadcast %c2_i32 : i32 to vector<8x128xi32>
    %27 = arith.cmpi eq, %8, %26 : vector<8x128xi32>
    %c2 = arith.constant 2 : index
    %28 = memref.load %arg3[%c2] : memref<8xi32, #tpu.memory_space<smem>>
    %29 = vector.broadcast %28 : i32 to vector<8x128xi32>
    %30 = arith.cmpi eq, %7, %29 : vector<8x128xi32>
    %31 = arith.andi %27, %30 : vector<8x128xi1>
    %cst_11 = arith.constant 1.000000e+00 : f32
    %32 = vector.broadcast %cst_11 : f32 to vector<8x128xf32>
    %33 = arith.select %31, %32, %25 : vector<8x128xi1>, vector<8x128xf32>
    %c3_i32 = arith.constant 3 : i32
    %34 = vector.broadcast %c3_i32 : i32 to vector<8x128xi32>
    %35 = arith.cmpi eq, %8, %34 : vector<8x128xi32>
    %c3 = arith.constant 3 : index
    %36 = memref.load %arg3[%c3] : memref<8xi32, #tpu.memory_space<smem>>
    %37 = vector.broadcast %36 : i32 to vector<8x128xi32>
    %38 = arith.cmpi eq, %7, %37 : vector<8x128xi32>
    %39 = arith.andi %35, %38 : vector<8x128xi1>
    %cst_12 = arith.constant 1.000000e+00 : f32
    %40 = vector.broadcast %cst_12 : f32 to vector<8x128xf32>
    %41 = arith.select %39, %40, %33 : vector<8x128xi1>, vector<8x128xf32>
    %c4_i32 = arith.constant 4 : i32
    %42 = vector.broadcast %c4_i32 : i32 to vector<8x128xi32>
    %43 = arith.cmpi eq, %8, %42 : vector<8x128xi32>
    %c4 = arith.constant 4 : index
    %44 = memref.load %arg3[%c4] : memref<8xi32, #tpu.memory_space<smem>>
    %45 = vector.broadcast %44 : i32 to vector<8x128xi32>
    %46 = arith.cmpi eq, %7, %45 : vector<8x128xi32>
    %47 = arith.andi %43, %46 : vector<8x128xi1>
    %cst_13 = arith.constant 1.000000e+00 : f32
    %48 = vector.broadcast %cst_13 : f32 to vector<8x128xf32>
    %49 = arith.select %47, %48, %41 : vector<8x128xi1>, vector<8x128xf32>
    %c5_i32 = arith.constant 5 : i32
    %50 = vector.broadcast %c5_i32 : i32 to vector<8x128xi32>
    %51 = arith.cmpi eq, %8, %50 : vector<8x128xi32>
    %c5 = arith.constant 5 : index
    %52 = memref.load %arg3[%c5] : memref<8xi32, #tpu.memory_space<smem>>
    %53 = vector.broadcast %52 : i32 to vector<8x128xi32>
    %54 = arith.cmpi eq, %7, %53 : vector<8x128xi32>
    %55 = arith.andi %51, %54 : vector<8x128xi1>
    %cst_14 = arith.constant 1.000000e+00 : f32
    %56 = vector.broadcast %cst_14 : f32 to vector<8x128xf32>
    %57 = arith.select %55, %56, %49 : vector<8x128xi1>, vector<8x128xf32>
    %c6_i32 = arith.constant 6 : i32
    %58 = vector.broadcast %c6_i32 : i32 to vector<8x128xi32>
    %59 = arith.cmpi eq, %8, %58 : vector<8x128xi32>
    %c6 = arith.constant 6 : index
    %60 = memref.load %arg3[%c6] : memref<8xi32, #tpu.memory_space<smem>>
    %61 = vector.broadcast %60 : i32 to vector<8x128xi32>
    %62 = arith.cmpi eq, %7, %61 : vector<8x128xi32>
    %63 = arith.andi %59, %62 : vector<8x128xi1>
    %cst_15 = arith.constant 1.000000e+00 : f32
    %64 = vector.broadcast %cst_15 : f32 to vector<8x128xf32>
    %65 = arith.select %63, %64, %57 : vector<8x128xi1>, vector<8x128xf32>
    %c7_i32 = arith.constant 7 : i32
    %66 = vector.broadcast %c7_i32 : i32 to vector<8x128xi32>
    %67 = arith.cmpi eq, %8, %66 : vector<8x128xi32>
    %c7 = arith.constant 7 : index
    %68 = memref.load %arg3[%c7] : memref<8xi32, #tpu.memory_space<smem>>
    %69 = vector.broadcast %68 : i32 to vector<8x128xi32>
    %70 = arith.cmpi eq, %7, %69 : vector<8x128xi32>
    %71 = arith.andi %67, %70 : vector<8x128xi1>
    %cst_16 = arith.constant 1.000000e+00 : f32
    %72 = vector.broadcast %cst_16 : f32 to vector<8x128xf32>
    %73 = arith.select %71, %72, %65 : vector<8x128xi1>, vector<8x128xf32>
    %c0_17 = arith.constant 0 : index
    %c0_18 = arith.constant 0 : index
    %74 = vector.load %arg5[%c0_17, %c0_18] : memref<8x128xf32, #tpu.memory_space<vmem>>, vector<8x128xf32>
    tpu.vector_store %arg5[%c0_17, %c0_18], %73 {strides = array<i32>} : memref<8x128xf32, #tpu.memory_space<vmem>>, vector<8x128xf32>,
    return
  }
}

</mosaic_0001>

<bundles_post_ra>
// kernel: tpu_custom_call.1
= control target key start
LH: loop header
LB: loop body
LE: loop exit
PB: predicated region body
PF: predicated region fallthrough
CT: control target
= control target key end

     0   :  { %11 = vsyncpa [#allocation3], 0  ;;  %s897_s0 = inlined_call_operand.hbm [shape: bf16[8,768], index: 0, kind: input, shape index: {}]   ;;  %s898_s1 = inlined_call_operand.hbm [shape: bf16[128,768], index: 1, kind: input, shape index: {}]   ;;  %s899_s2 = inlined_call_operand.vmem [shape: f32[1,128], index: 2, kind: input, shape index: {}]   ;;  %s900_s3 = inlined_call_operand.vmem [shape: s32[8], index: 3, kind: input, shape index: {}]   ;;  %s901_s4 = inlined_call_operand.hbm [shape: f32[8,128], index: 4, kind: output, shape index: {0}]   ;;  %s902_s5 = inlined_call_operand.hbm [shape: f32[8,128], index: 5, kind: output, shape index: {1}]  }
   0x1   :  { %12 = vsyncpa [#allocation7], 0 }
   0x2   :  { %13 = vsyncpa [#allocation5], 0 }
   0x3   :  { %14 = vsyncpa [#allocation4], 0 }
   0x4   :  { %15 = vsyncpa [#allocation11], 0  ;;  %s835_s18 = smov [#allocation2]   ;;  %s836_s20 = smov [#allocation6]  }
   0x5   :  { %s22_s19 = sshll.u32 %s835_s18, 4  ;;  %s31_s21 = sshll.u32 %s836_s20, 4  ;;  %s23_s19 = int_to_ptr.vmem [resolvable:$true] %s22_s19  ;;  %s32_s21 = int_to_ptr.vmem [resolvable:$true] %s31_s21 }
   0x6   :  { %s741_s22 = scalar_lea.vmem %s23_s19, 384  ;;  %p746_p1 = scmp.lt.s32.totalorder %s23_s19, %s23_s19 }
   0x7   :  { %p742_p0 = scmp.ne.s32.totalorder %s23_s19, %s741_s22  ;;  %p747_p2 = scmp.lt.s32.totalorder %s741_s22, %s741_s22 }
   0x9   :  { %p748_p3 = por %p747_p2, %p746_p1 }
   0xb   :  { %p749_p4 = pnand %p748_p3, %p742_p0 }
   0xd   :  { %752 = shalt.err (!%p749_p4)
}
   0xe   :  { %25 = dma.hbm_to_vmem [thread:$0]  %s897_s0, 384, %s23_s19, [#allocation3]  }
   0xf   :  { %s761_s25 = scalar_lea.vmem %s32_s21, 6144  ;;  %p766_p6 = scmp.lt.s32.totalorder %s32_s21, %s32_s21 }
  0x10   :  { %p762_p5 = scmp.ne.s32.totalorder %s32_s21, %s761_s25  ;;  %p767_p7 = scmp.lt.s32.totalorder %s761_s25, %s761_s25 }
  0x12   :  { %p768_p8 = por %p767_p7, %p766_p6 }
  0x14   :  { %p769_p9 = pnand %p768_p8, %p762_p5 }
  0x16   :  { %772 = shalt.err (!%p769_p9)
}
  0x17   :  { %s837_s26 = smov 384   ;;  %s838_s27 = smov 24  }
  0x18   :  { %37 = dma.hbm_to_vmem [thread:$0]  %s898_s1, 6144, %s32_s21, [#allocation7], %s837_s26, %s837_s26, %s838_s27  }
  0x19   :  { %s46_s7 = sshll.u32 %s900_s3, 4  ;;  %s47_s7 = int_to_ptr.vmem [resolvable:$true] %s46_s7 }
  0x1a   :  { %s773_s8 = scalar_lea.vmem %s47_s7, 16  ;;  %p778_p11 = scmp.lt.s32.totalorder %s47_s7, %s47_s7 }
  0x1b   :  { %p774_p10 = scmp.ne.s32.totalorder %s47_s7, %s773_s8  ;;  %p779_p12 = scmp.lt.s32.totalorder %s773_s8, %s773_s8 }
  0x1d   :  { %p780_p13 = por %p779_p12, %p778_p11 }
  0x1f   :  { %p781_p0 = pnand %p780_p13, %p774_p10 }
  0x21   :  { %784 = shalt.err (!%p781_p0)
}
  0x22   :  { %s839_s0 = smov [#allocation8]  }
  0x23   :  { %49 = dma.vmem_to_smem %s47_s7, 16, %s839_s0, [#allocation5]  }
  0x24   :  { %825 = dma.done.wait [#allocation3], 384  }
  0x25   :  { %826 = vsyncadd [#allocation3], 4294966912 }
  0x26   :  { %827 = dma.done.wait [#allocation7], 6144  }
  0x27   :  { %828 = vsyncadd [#allocation7], 4294961152 }
  0x28   :  { %829 = dma.done.wait [#allocation5], 16  }
  0x29   :  { %830 = vsyncadd [#allocation5], 4294967280 }
  0x2a   :  { %59 = sfence }
  0x2b   :  { %v655_v0 = vld [vmem:[#allocation6 + $0x154] ss:$24 sps:$4 sm:$0xff]   ;;  %v657_v1 = vld [vmem:[#allocation6 + $0x150] ss:$24 sps:$4 sm:$0xff]   ;;  %v661_v4 = vld [vmem:[#allocation6 + $0x124] ss:$24 sps:$4 sm:$0xff]   ;;  %v501_v57 = vlaneseq }
  0x2c   :  { %380 = vmatprep.subr.bf16.mxu0 %v655_v0  ;;  %v658_v2 = vld [vmem:[#allocation6 + $0x15c] ss:$24 sps:$4 sm:$0xff]   ;;  %v660_v3 = vld [vmem:[#allocation6 + $0x158] ss:$24 sps:$4 sm:$0xff]   ;;  %v664_v5 = vld [vmem:[#allocation6 + $0x12c] ss:$24 sps:$4 sm:$0xff]  }
  0x2d   :  { %381 = vmatpush1.bf16.xpose.msra.mxu0 %v657_v1  ;;  %420 = vmatprep.subr.bf16.mxu1 %v658_v2  ;;  %v663_v6 = vld [vmem:[#allocation6 + $0x120] ss:$24 sps:$4 sm:$0xff]   ;;  %v667_v7 = vld [vmem:[#allocation6 + $0xf4] ss:$24 sps:$4 sm:$0xff]   ;;  %v669_v10 = vld [vmem:[#allocation6 + $0xf0] ss:$24 sps:$4 sm:$0xff]  }
  0x2e   :  { %421 = vmatpush1.bf16.xpose.msra.mxu1 %v660_v3  ;;  %382 = vmatprep.subr.bf16.mxu0 %v661_v4  ;;  %v666_v8 = vld [vmem:[#allocation6 + $0x128] ss:$24 sps:$4 sm:$0xff]   ;;  %v670_v9 = vld [vmem:[#allocation6 + $0xfc] ss:$24 sps:$4 sm:$0xff]   ;;  %v672_v12 = vld [vmem:[#allocation6 + $0xf8] ss:$24 sps:$4 sm:$0xff]  }
  0x2f   :  { %422 = vmatprep.subr.bf16.mxu1 %v664_v5  ;;  %v673_v11 = vld [vmem:[#allocation6 + $0xc4] ss:$24 sps:$4 sm:$0xff]   ;;  %v61_v14 = vld [vmem:[#allocation2] sm:$0xff]  ;;  %v675_v15 = vld [vmem:[#allocation6 + $0xc0] ss:$24 sps:$4 sm:$0xff]   ;;  %s506_s1 = sld [smem:[#allocation8]] }
  0x30   :  { %v676_v13 = vld [vmem:[#allocation6 + $0xcc] ss:$24 sps:$4 sm:$0xff]   ;;  %v587_v16 = vcombine.high %v61_v14, %v61_v14  ;;  %v62_v17 = vld [vmem:[#allocation2 + $0x8] sm:$0xff]  ;;  %v678_v20 = vld [vmem:[#allocation6 + $0xc8] ss:$24 sps:$4 sm:$0xff]   ;;  %v586_v38 = vcombine.low %v61_v14, %v61_v14  ;;  %s640_s3 = sld [smem:[#allocation8 + $0x1]] }
  0x31   :  { %v679_v18 = vld [vmem:[#allocation6 + $0x94] ss:$24 sps:$4 sm:$0xff]   ;;  %v589_v19 = vcombine.high %v62_v17, %v62_v17  ;;  %v681_v22 = vld [vmem:[#allocation6 + $0x90] ss:$24 sps:$4 sm:$0xff]   ;;  %v685_v23 = vld [vmem:[#allocation6 + $0x64] ss:$24 sps:$4 sm:$0xff]   ;;  %v588_v41 = vcombine.low %v62_v17, %v62_v17 }
  0x32   :  { %412 = vmatprep.mubr.bf16.mxu0 %v587_v16  ;;  %v682_v21 = vld [vmem:[#allocation6 + $0x9c] ss:$24 sps:$4 sm:$0xff]   ;;  %v684_v24 = vld [vmem:[#allocation6 + $0x98] ss:$24 sps:$4 sm:$0xff]   ;;  %v688_v25 = vld [vmem:[#allocation6 + $0x6c] ss:$24 sps:$4 sm:$0xff]  }
  0x33   :  { %452 = vmatprep.mubr.bf16.mxu1 %v589_v19  ;;  %v687_v26 = vld [vmem:[#allocation6 + $0x60] ss:$24 sps:$4 sm:$0xff]   ;;  %v691_v27 = vld [vmem:[#allocation6 + $0x34] ss:$24 sps:$4 sm:$0xff]   ;;  %v693_v30 = vld [vmem:[#allocation6 + $0x30] ss:$24 sps:$4 sm:$0xff]  }
  0x34   :  { %v690_v28 = vld [vmem:[#allocation6 + $0x68] ss:$24 sps:$4 sm:$0xff]   ;;  %v694_v29 = vld [vmem:[#allocation6 + $0x3c] ss:$24 sps:$4 sm:$0xff]   ;;  %v696_v32 = vld [vmem:[#allocation6 + $0x38] ss:$24 sps:$4 sm:$0xff]  }
  0x35   :  { %383 = vmatpush1.bf16.xpose.msra.mxu0 %v663_v6  ;;  %v697_v31 = vld [vmem:[#allocation6 + $0x4] ss:$24 sps:$4 sm:$0xff]   ;;  %v699_v34 = vld [vmem:[#allocation6] ss:$24 sps:$4 sm:$0xff]   ;;  %v712_v42 = vld [vmem:[#allocation6 + $0x134] ss:$24 sps:$4 sm:$0xff]   ;;  %v507_v60 = vstv %s506_s1 }
  0x36   :  { %384 = vmatprep.subr.bf16.mxu0 %v667_v7  ;;  %423 = vmatpush1.bf16.xpose.msra.mxu1 %v666_v8  ;;  %v700_v33 = vld [vmem:[#allocation6 + $0xc] ss:$24 sps:$4 sm:$0xff]   ;;  %v702_v36 = vld [vmem:[#allocation6 + $0x8] ss:$24 sps:$4 sm:$0xff]   ;;  %v63_v37 = vld [vmem:[#allocation2 + $0x10] sm:$0xff]  ;;  %s641_s9 = sld [smem:[#allocation8 + $0x2]]  ;;  %v513_v61 = vstv %s640_s3 }
  0x37   :  { %424 = vmatprep.subr.bf16.mxu1 %v670_v9  ;;  %v707_v35 = vld [vmem:[#allocation6 + $0x164] ss:$24 sps:$4 sm:$0xff]   ;;  %v705_v39 = vld [vmem:[#allocation6 + $0x160] ss:$24 sps:$4 sm:$0xff]   ;;  %v591_v40 = vcombine.high %v63_v37, %v63_v37  ;;  %v710_v43 = vld [vmem:[#allocation6 + $0x130] ss:$24 sps:$4 sm:$0xff]   ;;  %v590_v56 = vcombine.low %v63_v37, %v63_v37 }
  0x38   :  { %v715_v44 = vld [vmem:[#allocation6 + $0x104] ss:$24 sps:$4 sm:$0xff]   ;;  %v713_v45 = vld [vmem:[#allocation6 + $0x100] ss:$24 sps:$4 sm:$0xff]   ;;  %v718_v46 = vld [vmem:[#allocation6 + $0xd4] ss:$24 sps:$4 sm:$0xff]  }
  0x39   :  { %v716_v47 = vld [vmem:[#allocation6 + $0xd0] ss:$24 sps:$4 sm:$0xff]   ;;  %v721_v48 = vld [vmem:[#allocation6 + $0xa4] ss:$24 sps:$4 sm:$0xff]   ;;  %v719_v49 = vld [vmem:[#allocation6 + $0xa0] ss:$24 sps:$4 sm:$0xff]  }
  0x3a   :  { %v724_v50 = vld [vmem:[#allocation6 + $0x74] ss:$24 sps:$4 sm:$0xff]   ;;  %v722_v51 = vld [vmem:[#allocation6 + $0x70] ss:$24 sps:$4 sm:$0xff]   ;;  %v727_v52 = vld [vmem:[#allocation6 + $0x44] ss:$24 sps:$4 sm:$0xff]  }
  0x3b   :  { %v725_v53 = vld [vmem:[#allocation6 + $0x40] ss:$24 sps:$4 sm:$0xff]   ;;  %v730_v54 = vld [vmem:[#allocation6 + $0x14] ss:$24 sps:$4 sm:$0xff]   ;;  %v728_v55 = vld [vmem:[#allocation6 + $0x10] ss:$24 sps:$4 sm:$0xff]  }
  0x3c   :  { %s642_s10 = sld [smem:[#allocation8 + $0x3]]  ;;  %v502_v58 = vand.u32 127, %v501_v57  ;;  %v504_v59 = vshrl.u32 %v501_v57, 7  ;;  %v519_v62 = vstv %s641_s9  ;;  %v840_v63 = vmov 0.0   ;;  %s841_s15 = smov [#allocation10]  }
  0x3d   :  { %385 = vmatpush1.bf16.xpose.msra.mxu0 %v669_v10  ;;  %s643_s11 = sld [smem:[#allocation8 + $0x4]]  ;;  %s570_s16 = sshll.u32 %s841_s15, 4  ;;  %s571_s16 = int_to_ptr.vmem [resolvable:$true] %s570_s16 }
  0x3e   :  { %386 = vmatprep.subr.bf16.mxu0 %v673_v11  ;;  %425 = vmatpush1.bf16.xpose.msra.mxu1 %v672_v12  ;;  %s644_s12 = sld [smem:[#allocation8 + $0x5]]  ;;  %vm505_vm0 = vcmp.eq.s32.totalorder %v504_v59, 0  ;;  %vm508_vm1 = vcmp.eq.s32.totalorder %v502_v58, %v507_v60  ;;  %vm511_vm3 = vcmp.eq.s32.totalorder %v504_v59, 1  ;;  %vm514_vm4 = vcmp.eq.s32.totalorder %v502_v58, %v513_v61  ;;  %s785_s17 = scalar_lea.vmem %s571_s16, 128 }
  0x3f   :  { %426 = vmatprep.subr.bf16.mxu1 %v676_v13  ;;  %s882_s13 = sld [smem:[#allocation8 + $0x6]]  ;;  %vm509_vm2 = vmand %vm505_vm0, %vm508_vm1  ;;  %vm517_vm6 = vcmp.eq.s32.totalorder %v504_v59, 2  ;;  %vm520_vm7 = vcmp.eq.s32.totalorder %v502_v58, %v519_v62  ;;  %vm523_vm9 = vcmp.eq.s32.totalorder %v504_v59, 3  ;;  %vm529_vm12 = vcmp.eq.s32.totalorder %v504_v59, 4  ;;  %p786_p1 = scmp.ne.s32.totalorder %s571_s16, %s785_s17 }
  0x40   :  { %s884_s14 = sld [smem:[#allocation8 + $0x7]]  ;;  %v510_v0 = vsel %vm509_vm2, 1.0, %v840_v63  ;;  %vm515_vm5 = vmand %vm511_vm3, %vm514_vm4  ;;  %vm535_vm15 = vcmp.eq.s32.totalorder %v504_v59, 5  ;;  %vm541_vm2 = vcmp.eq.s32.totalorder %v504_v59, 6  ;;  %p790_p2 = scmp.lt.s32.totalorder %s571_s16, %s571_s16 }
  0x41   :  { %v516_v2 = vsel %vm515_vm5, 1.0, %v510_v0  ;;  %vm521_vm8 = vmand %vm517_vm6, %vm520_vm7  ;;  %vm547_vm5 = vcmp.eq.s32.totalorder %v504_v59, 7  ;;  %p791_p3 = scmp.lt.s32.totalorder %s785_s17, %s785_s17 }
  0x42   :  { %v525_v1 = vstv %s642_s10  ;;  %v522_v4 = vsel %vm521_vm8, 1.0, %v516_v2 }
  0x43   :  { %vm526_vm10 = vcmp.eq.s32.totalorder %v502_v58, %v525_v1  ;;  %v531_v3 = vstv %s643_s11  ;;  %p792_p4 = por %p791_p3, %p790_p2 }
  0x44   :  { %vm527_vm11 = vmand %vm523_vm9, %vm526_vm10  ;;  %vm532_vm13 = vcmp.eq.s32.totalorder %v502_v58, %v531_v3  ;;  %v537_v5 = vstv %s644_s12 }
  0x45   :  { %387 = vmatpush1.bf16.xpose.msra.mxu0 %v675_v15  ;;  %v528_v6 = vsel %vm527_vm11, 1.0, %v522_v4  ;;  %vm533_vm14 = vmand %vm529_vm12, %vm532_vm13  ;;  %vm538_vm0 = vcmp.eq.s32.totalorder %v502_v58, %v537_v5  ;;  %v543_v7 = vstv %s882_s13  ;;  %p793_p5 = pnand %p792_p4, %p786_p1 }
  0x46   :  { %388 = vmatprep.subr.bf16.mxu0 %v679_v18  ;;  %427 = vmatpush1.bf16.xpose.msra.mxu1 %v678_v20  ;;  %v534_v8 = vsel %vm533_vm14, 1.0, %v528_v6  ;;  %vm539_vm1 = vmand %vm535_vm15, %vm538_vm0  ;;  %vm544_vm3 = vcmp.eq.s32.totalorder %v502_v58, %v543_v7  ;;  %v549_v9 = vstv %s884_s14 }
  0x47   :  { %428 = vmatprep.subr.bf16.mxu1 %v682_v21  ;;  %v540_v10 = vsel %vm539_vm1, 1.0, %v534_v8  ;;  %vm545_vm4 = vmand %vm541_vm2, %vm544_vm3  ;;  %vm550_vm6 = vcmp.eq.s32.totalorder %v502_v58, %v549_v9 }
  0x48   :  { %v546_v11 = vsel %vm545_vm4, 1.0, %v540_v10  ;;  %vm551_vm7 = vmand %vm547_vm5, %vm550_vm6 }
  0x49   :  { %v552_v12 = vsel %vm551_vm7, 1.0, %v546_v11 }
  0x4a   :  { %553 = vst [vmem:[#allocation10] sm:$0xff] %v552_v12 }
  0x4d   :  { %389 = vmatpush1.bf16.xpose.msra.mxu0 %v681_v22 }
  0x4e   :  { %390 = vmatprep.subr.bf16.mxu0 %v685_v23  ;;  %429 = vmatpush1.bf16.xpose.msra.mxu1 %v684_v24 }
  0x4f   :  { %430 = vmatprep.subr.bf16.mxu1 %v688_v25 }
  0x55   :  { %391 = vmatpush1.bf16.xpose.msra.mxu0 %v687_v26 }
  0x56   :  { %392 = vmatprep.subr.bf16.mxu0 %v691_v27  ;;  %431 = vmatpush1.bf16.xpose.msra.mxu1 %v690_v28 }
  0x57   :  { %432 = vmatprep.subr.bf16.mxu1 %v694_v29 }
  0x5d   :  { %393 = vmatpush1.bf16.xpose.msra.mxu0 %v693_v30 }
  0x5e   :  { %394 = vmatprep.subr.bf16.mxu0 %v697_v31  ;;  %433 = vmatpush1.bf16.xpose.msra.mxu1 %v696_v32 }
  0x5f   :  { %434 = vmatprep.subr.bf16.mxu1 %v700_v33 }
  0x65   :  { %395 = vmatpush1.bf16.xpose.msra.mxu0 %v699_v34 }
  0x66   :  { %460 = vmatprep.subr.bf16.mxu0 %v707_v35  ;;  %435 = vmatpush1.bf16.xpose.msra.mxu1 %v702_v36 }
  0x6c   :  { %413 = vmatmul.mubr.bf16.vlgmr.msra.gmra.mxu0 %v586_v38 }
  0x6d   :  { %461 = vmatpush1.bf16.xpose.msra.mxu0 %v705_v39  ;;  %492 = vmatprep.mubr.bf16.mxu0 %v591_v40 }
  0x6e   :  { %453 = vmatmul.mubr.bf16.vlgmr.msra.gmra.mxu1 %v588_v41  ;;  %462 = vmatprep.subr.bf16.mxu0 %v712_v42 }
  0x75   :  { %463 = vmatpush1.bf16.xpose.msra.mxu0 %v710_v43 }
  0x76   :  { %464 = vmatprep.subr.bf16.mxu0 %v715_v44 }
  0x7d   :  { %465 = vmatpush1.bf16.xpose.msra.mxu0 %v713_v45 }
  0x7e   :  { %466 = vmatprep.subr.bf16.mxu0 %v718_v46 }
  0x85   :  { %467 = vmatpush1.bf16.xpose.msra.mxu0 %v716_v47 }
  0x86   :  { %468 = vmatprep.subr.bf16.mxu0 %v721_v48 }
  0x8d   :  { %469 = vmatpush1.bf16.xpose.msra.mxu0 %v719_v49 }
  0x8e   :  { %470 = vmatprep.subr.bf16.mxu0 %v724_v50 }
  0x95   :  { %471 = vmatpush1.bf16.xpose.msra.mxu0 %v722_v51 }
  0x96   :  { %472 = vmatprep.subr.bf16.mxu0 %v727_v52 }
  0x9d   :  { %473 = vmatpush1.bf16.xpose.msra.mxu0 %v725_v53 }
  0x9e   :  { %474 = vmatprep.subr.bf16.mxu0 %v730_v54 }
  0xa5   :  { %475 = vmatpush1.bf16.xpose.msra.mxu0 %v728_v55 }
  0xac   :  { %493 = vmatmul.mubr.bf16.vlgmr.msra.gmra.mxu0 %v590_v56 }
  0xad   :  { %796 = shalt.err (!%p793_p5)
}
  0xae   :  { %573 = dma.vmem_to_hbm [thread:$0]  %s571_s16, 128, %s902_s5, [#allocation11]   ;;  %v585_v21 = vld [vmem:[%s899_s2] ss:$0 sm:$0xff] }
  0xaf   :  { %s842_s22 = smov [#allocation9]  }
  0xb0   :  { %s560_s23 = sshll.u32 %s842_s22, 4  ;;  %s561_s23 = int_to_ptr.vmem [resolvable:$true] %s560_s23 }
  0xb1   :  { %s805_s5 = scalar_lea.vmem %s561_s23, 128  ;;  %p810_p7 = scmp.lt.s32.totalorder %s561_s23, %s561_s23 }
  0xb2   :  { %p806_p6 = scmp.ne.s32.totalorder %s561_s23, %s805_s5  ;;  %p811_p8 = scmp.lt.s32.totalorder %s805_s5, %s805_s5 }
  0xb4   :  { %p812_p9 = por %p811_p8, %p810_p7 }
  0xb6   :  { %p813_p10 = pnand %p812_p9, %p806_p6 }
 0x12c   :  { %v414_v13 = vpop.f32.mrf.mxu0 }
 0x12d   :  { %v415_v22 = vadd.f32 %v585_v21, %v414_v13 }
 0x12e   :  { %v416_v14 = vpop.f32.mrf.mxu0  ;;  %v454_v15 = vpop.f32.mrf.mxu1 }
 0x12f   :  { %v455_v23 = vadd.f32 %v454_v15, %v415_v22 }
 0x130   :  { %v417_v16 = vpop.f32.mrf.mxu0  ;;  %v456_v17 = vpop.f32.mrf.mxu1 }
 0x132   :  { %v418_v18 = vpop.f32.mrf.mxu0  ;;  %v457_v19 = vpop.f32.mrf.mxu1 }
 0x134   :  { %v458_v20 = vpop.f32.mrf.mxu1 }
 0x16c   :  { %v494_v24 = vpop.f32.mrf.mxu0 }
 0x16d   :  { %v495_v25 = vadd.f32 %v494_v24, %v455_v23 }
 0x16e   :  { %v496_v26 = vpop.f32.mrf.mxu0 }
 0x16f   :  { %500 = vst [vmem:[#allocation9] sm:$0xff] %v495_v25 }
 0x170   :  { %v497_v27 = vpop.f32.mrf.mxu0 }
 0x171   :  { %816 = shalt.err (!%p813_p10)
}
 0x172   :  { %563 = dma.vmem_to_hbm [thread:$0]  %s561_s23, 128, %s901_s4, [#allocation4]   ;;  %v498_v28 = vpop.f32.mrf.mxu0 }
 0x173   :  { %831 = dma.done.wait [#allocation4], 128  }
 0x174   :  { %832 = vsyncadd [#allocation4], 4294967168 }
 0x175   :  { %833 = dma.done.wait [#allocation11], 128  }
 0x176   :  { %834 = vsyncadd [#allocation11], 4294967168 }
 0x177   :  { %580 = vsyncpa [#allocation3], 1 }
 0x178   :  { %581 = vsyncpa [#allocation7], 1 }
 0x179   :  { %582 = vsyncpa [#allocation4], 1 }
 0x17a   :  { %583 = vsyncpa [#allocation11], 1 }
 0x17b   :  { %584 = vsyncpa [#allocation5], 1 }

</bundles_post_ra>
